<compile_context>
chip_gen: v7x
topology: tpu7x:2x2x1
jax: 0.10.0
libtpu: 0.0.40
codegen_flags: <defaults>
</compile_context>

<pallas_src>
import jax
import jax.numpy as jnp
from jax.experimental import pallas as pl
from jax.experimental.pallas import tpu as pltpu


def _round_up(x, m):
    return -(-x // m) * m


def _round_down(x, m):
    return (x // m) * m


def _vmem_budgets():
    """(per-input-buffer budget, scoped vmem_limit_bytes), generation-aware."""
    # Conservative defaults are safe on every generation (v7x: 64 MiB per TC,
    # default scoped limit 32 MiB -> we raise to 44 MiB which still fits).
    per_buffer, limit = 14 << 20, 44 << 20
    try:
        cap = int(pltpu.get_tpu_info().vmem_capacity_bytes)
        if cap >= (96 << 20):  # v5e / v6e: 128 MiB VMEM per core
            per_buffer, limit = 22 << 20, 64 << 20
    except Exception:
        pass  # keep conservative values if the query is unavailable
    return per_buffer, limit


def _choose_tiles(B, V, D, itemsize, budget_bytes):
    """Pick (TB, TD, VT) respecting (8,128)-style layout rules and a VMEM budget
    that accounts for sublane padding of the views axis."""
    # Sublane packing multiple: 8 (32-bit), 16 (16-bit), 32 (8-bit).
    sub = {4: 8, 2: 16, 1: 32}.get(itemsize, 8)
    lane_ok = (D % 128 == 0)
    V_pad = _round_up(V, sub)  # real VMEM extent of the (padded) views axis

    # ---- views tile (reduction axis; last grid dim, 'arbitrary') ----
    # Prefer VT = V (single reduction step, no maximum-carry). Split into
    # sublane-multiple chunks only when even a minimal (sub, V_pad, 128) tile
    # would blow the per-buffer budget (very large V and/or D).
    min_td = 128 if lane_ok else D
    if sub * V_pad * min_td * itemsize <= budget_bytes:
        VT, VT_pad = V, V_pad
    else:
        VT, VT_pad = sub, sub  # sub is always a multiple of 8 -> legal block dim

    # ---- feature tile (lanes) ----
    if lane_ok:
        td_budget = budget_bytes // max(1, sub * VT_pad * itemsize)
        td_budget = max(128, _round_down(td_budget, 128))
        TD = min(D, td_budget)  # prefer full D: one contiguous HBM slab per step
    else:
        # TODO(synk): tile non-128-aligned D with 128-multiple blocks (masked
        # edge) if such shapes ever get large; full-extent is legal and simple.
        TD = D

    # ---- batch tile (sublanes) ----
    max_tb = budget_bytes // max(1, VT_pad * TD * itemsize)
    if B <= sub:
        TB = B
    else:
        TB = min(B, 1024, max(sub, _round_down(max_tb, sub)))
    return TB, TD, VT, sub


def _ensure_two_blocks(B, D, TB, TD, sub, total_bytes):
    """Guarantee >= 2 blocks on a 'parallel' axis for non-trivial problems so
    both v7x TensorCores get work (negligible cost on single-TC v5e/v6e)."""
    if total_bytes < (4 << 20):
        return TB, TD
    if pl.cdiv(B, TB) * pl.cdiv(D, TD) >= 2:
        return TB, TD
    if B >= 2 * sub:
        TB = _round_up(pl.cdiv(B, 2), sub)
    elif D >= 256 and D % 128 == 0:
        TD = _round_up(pl.cdiv(D, 2), 128)
    return TB, TD


def _make_kernel(V_total, VT, dtype):
    """Max over the views axis, accumulated across the last ('arbitrary') grid axis."""
    needs_mask = (V_total % VT) != 0
    if jnp.issubdtype(jnp.dtype(dtype), jnp.floating):
        fill = -jnp.inf
    else:
        fill = int(jnp.iinfo(dtype).min)

    def kernel(x_ref, o_ref):
        x = x_ref[...]  # (TB, VT, TD)
        if needs_mask:
            # Mask the padded tail of the views axis so out-of-bounds garbage
            # never wins the max.
            v0 = pl.program_id(2) * VT
            vid = v0 + jax.lax.broadcasted_iota(jnp.int32, x.shape, 1)
            x = jnp.where(vid < V_total, x, jnp.asarray(fill, x.dtype))
        vmax = jnp.max(x, axis=1)  # (TB, TD)

        @pl.when(pl.program_id(2) == 0)
        def _init():
            o_ref[...] = vmax

        @pl.when(pl.program_id(2) > 0)
        def _accumulate():
            o_ref[...] = jnp.maximum(o_ref[...], vmax)

    return kernel


def maxpool_fusion(view_features: jax.Array, *, _force_tiles=None) -> jax.Array:
    """view_features: [B, V, D] -> [B, D] (max over views, == torch.max(x, 1)[0])."""
    B, V, D = view_features.shape
    dtype = view_features.dtype
    itemsize = jnp.dtype(dtype).itemsize

    per_buffer_budget, vmem_limit = _vmem_budgets()
    if _force_tiles is None:
        TB, TD, VT, sub = _choose_tiles(B, V, D, itemsize, per_buffer_budget)
        TB, TD = _ensure_two_blocks(B, D, TB, TD, sub, B * V * D * itemsize)
    else:
        TB, TD, VT = _force_tiles  # testing hook

    grid = (pl.cdiv(B, TB), pl.cdiv(D, TD), pl.cdiv(V, VT))
    kernel = _make_kernel(V, VT, dtype)

    cost = pl.CostEstimate(
        flops=B * V * D,  # one compare per input element
        transcendentals=0,
        bytes_accessed=(B * V * D + B * D) * itemsize,
    )

    return pl.pallas_call(
        kernel,
        out_shape=jax.ShapeDtypeStruct((B, D), dtype),
        grid_spec=pltpu.PrefetchScalarGridSpec(
            num_scalar_prefetch=0,
            grid=grid,
            in_specs=[pl.BlockSpec((TB, VT, TD), lambda i, j, k: (i, k, j))],
            # Output block index independent of k -> output-resident accumulator.
            out_specs=pl.BlockSpec((TB, TD), lambda i, j, k: (i, j)),
        ),
        compiler_params=pltpu.CompilerParams(
            dimension_semantics=("parallel", "parallel", "arbitrary"),
            vmem_limit_bytes=vmem_limit,
        ),
        cost_estimate=cost,
    )(view_features)


if __name__ == "__main__":
    key = jax.random.PRNGKey(0)
    k1, k2, k3 = jax.random.split(key, 3)

    # Case 1: shape from the module docstring [batch, num_views, feature_dim].
    x1 = jax.random.normal(k1, (2, 8, 128), dtype=jnp.float32)
    o1 = jax.block_until_ready(maxpool_fusion(x1))
    assert o1.shape == (2, 128)
    assert jnp.allclose(o1, jnp.max(x1, axis=1)), "mismatch (case 1)"

    # Case 2: sublane-dense output tile (TB >= sublane multiple), bf16 path.
    x2 = jax.random.normal(k2, (16, 4, 256), dtype=jnp.bfloat16)
    o2 = jax.block_until_ready(maxpool_fusion(x2))
    assert o2.shape == (16, 256)
    assert jnp.array_equal(o2, jnp.max(x2, axis=1)), "mismatch (case 2)"

    # Case 3: exercise the split-V 'arbitrary' axis accumulator, including the
    # masked tail block (V=10, VT=8 -> last block has 2 valid views).
    x3 = jax.random.normal(k3, (8, 10, 128), dtype=jnp.float32)
    o3 = jax.block_until_ready(maxpool_fusion(x3, _force_tiles=(8, 128, 8)))
    assert o3.shape == (8, 128)
    assert jnp.allclose(o3, jnp.max(x3, axis=1)), "mismatch (case 3)"

    print("KERNEL_OK")
</pallas_src>

<mosaic_0001>
module attributes {stable_mosaic.version = 11 : i64} {
  func.func @kernel(%arg0: i32, %arg1: i32, %arg2: i32, %arg3: memref<2x8x128xf32, #tpu.memory_space<vmem>>, %arg4: memref<2x128xf32, #tpu.memory_space<vmem>>) attributes {dimension_semantics = [#tpu.dimension_semantics<parallel>, #tpu.dimension_semantics<parallel>, #tpu.dimension_semantics<arbitrary>], iteration_bounds = array<i64: 1, 1, 1>, scalar_prefetch = 0 : i64, scratch_operands = 0 : i64, tpu.core_type = #tpu.core_type<tc>, window_params = [{transform_indices = @transform_0, window_bounds = array<i64: 2, 8, 128>}, {transform_indices = @transform_1, window_bounds = array<i64: 2, 128>}]} {
    %c0 = arith.constant 0 : index
    %c0_0 = arith.constant 0 : index
    %c0_1 = arith.constant 0 : index
    %0 = vector.load %arg3[%c0, %c0_0, %c0_1] : memref<2x8x128xf32, #tpu.memory_space<vmem>>, vector<2x8x128xf32>
    %cst = arith.constant dense<0xFF800000> : vector<2x128xf32>
    %1 = vector.multi_reduction <maximumf>, %0, %cst [1] : vector<2x8x128xf32> to vector<2x128xf32>
    %c0_i32 = arith.constant 0 : i32
    %2 = arith.cmpi eq, %arg2, %c0_i32 : i32
    %3 = arith.extui %2 : i1 to i32
    %c0_i32_2 = arith.constant 0 : i32
    %4 = arith.cmpi ne, %3, %c0_i32_2 : i32
    scf.if %4 {
      %c0_5 = arith.constant 0 : index
      %c0_6 = arith.constant 0 : index
      %8 = vector.load %arg4[%c0_5, %c0_6] : memref<2x128xf32, #tpu.memory_space<vmem>>, vector<2x128xf32>
      tpu.vector_store %arg4[%c0_5, %c0_6], %1 {strides = array<i32>} : memref<2x128xf32, #tpu.memory_space<vmem>>, vector<2x128xf32>,
    } else {
    }
    %c0_i32_3 = arith.constant 0 : i32
    %5 = arith.cmpi sgt, %arg2, %c0_i32_3 : i32
    %6 = arith.extui %5 : i1 to i32
    %c0_i32_4 = arith.constant 0 : i32
    %7 = arith.cmpi ne, %6, %c0_i32_4 : i32
    scf.if %7 {
      %c0_5 = arith.constant 0 : index
      %c0_6 = arith.constant 0 : index
      %8 = vector.load %arg4[%c0_5, %c0_6] : memref<2x128xf32, #tpu.memory_space<vmem>>, vector<2x128xf32>
      %9 = arith.maximumf %8, %1 : vector<2x128xf32>
      %c0_7 = arith.constant 0 : index
      %c0_8 = arith.constant 0 : index
      %10 = vector.load %arg4[%c0_7, %c0_8] : memref<2x128xf32, #tpu.memory_space<vmem>>, vector<2x128xf32>
      tpu.vector_store %arg4[%c0_7, %c0_8], %9 {strides = array<i32>} : memref<2x128xf32, #tpu.memory_space<vmem>>, vector<2x128xf32>,
    } else {
    }
    return
  }
  func.func @transform_0(%arg0: i32, %arg1: i32, %arg2: i32) -> (i32, i32, i32) {
    %c0_i32 = arith.constant 0 : i32
    return %arg0, %arg2, %arg1 : i32, i32, i32
  }
  func.func @transform_1(%arg0: i32, %arg1: i32, %arg2: i32) -> (i32, i32) {
    %c0_i32 = arith.constant 0 : i32
    return %arg0, %arg1 : i32, i32
  }
}

</mosaic_0001>

<bundles_post_ra>
// kernel: tpu_custom_call.1
= control target key start
LH: loop header
LB: loop body
LE: loop exit
PB: predicated region body
PF: predicated region fallthrough
CT: control target
= control target key end

     0   :  { %6 = vsyncpa [#allocation3], 0  ;;  %s164_s0 = inlined_call_operand.hbm [shape: f32[2,8,128], index: 0, kind: input, shape index: {}]   ;;  %s165_s1 = inlined_call_operand.hbm [shape: f32[2,128], index: 1, kind: output, shape index: {}]  }
   0x1   :  { %7 = vsyncpa [#allocation4], 0  ;;  %s126_s6 = smov [#allocation2]   ;;  %s78_s10 = scalar_lea.hbm %s164_s0, 256 }
   0x2   :  { %s13_s7 = sshll.u32 %s126_s6, 4  ;;  %p79_p0 = scmp.ne.s32.totalorder %s164_s0, %s78_s10  ;;  %s14_s7 = int_to_ptr.vmem [resolvable:$true] %s13_s7 }
   0x3   :  { %p82_p1 = scmp.lt.u32.totalorder %s78_s10, %s164_s0 }
   0x5   :  { %p84_p2 = pnand %p82_p1, %p79_p0 }
   0x7   :  { %87 = shalt.err (!%p84_p2)
}
   0x8   :  { %s88_s15 = scalar_lea.vmem %s14_s7, 256  ;;  %p93_p4 = scmp.lt.s32.totalorder %s14_s7, %s14_s7 }
   0x9   :  { %p89_p3 = scmp.ne.s32.totalorder %s14_s7, %s88_s15  ;;  %p94_p5 = scmp.lt.s32.totalorder %s88_s15, %s88_s15 }
   0xb   :  { %p95_p6 = por %p94_p5, %p93_p4 }
   0xd   :  { %p96_p7 = pnand %p95_p6, %p89_p3 }
   0xf   :  { %99 = shalt.err (!%p96_p7)
}
  0x10   :  { %s127_s16 = smov 128   ;;  %s128_s17 = smov 8  }
  0x11   :  { %19 = dma.hbm_to_vmem [thread:$0]  %s164_s0, 256, %s14_s7, [#allocation3], %s127_s16, %s127_s16, %s128_s17  }
  0x12   :  { %122 = dma.done.wait [#allocation3], 256  }
  0x13   :  { %123 = vsyncadd [#allocation3], 4294967040  ;;  %v23_v0 = vld [vmem:[#allocation2] sm:$0xff]  ;;  %v24_v1 = vld [vmem:[#allocation2 + $0x8] sm:$0xff]  ;;  %s129_s20 = smov [#allocation5]   ;;  %vm43_vm0 = vcmask 1041409  }
  0x14   :  { %v25_v2 = vrot.slane %v23_v0, 4  ;;  %v31_v3 = vrot.slane %v24_v1, 4  ;;  %s65_s21 = sshll.u32 %s129_s20, 4  ;;  %s66_s21 = int_to_ptr.vmem [resolvable:$true] %s65_s21 }
  0x15   :  { %s100_s0 = scalar_lea.vmem %s66_s21, 32  ;;  %p105_p9 = scmp.lt.s32.totalorder %s66_s21, %s66_s21 }
  0x16   :  { %v26_v4 = vmax.f32 %v23_v0, %v25_v2  ;;  %v32_v5 = vmax.f32 %v24_v1, %v31_v3  ;;  %p101_p8 = scmp.ne.s32.totalorder %s66_s21, %s100_s0  ;;  %p106_p10 = scmp.lt.s32.totalorder %s100_s0, %s100_s0 }
  0x18   :  { %v27_v6 = vrot.slane %v26_v4, 2  ;;  %v33_v7 = vrot.slane %v32_v5, 2  ;;  %p107_p11 = por %p106_p10, %p105_p9 }
  0x1a   :  { %v28_v8 = vmax.f32 %v26_v4, %v27_v6  ;;  %v34_v9 = vmax.f32 %v32_v5, %v33_v7  ;;  %p108_p12 = pnand %p107_p11, %p101_p8 }
  0x1c   :  { %v29_v10 = vrot.slane %v28_v8, 1  ;;  %v35_v11 = vrot.slane %v34_v9, 1 }
  0x1e   :  { %v30_v12 = vmax.f32 %v28_v8, %v29_v10  ;;  %v36_v13 = vmax.f32 %v34_v9, %v35_v11 }
  0x20   :  { %v44_v14 = vsel %vm43_vm0, %v36_v13, %v30_v12 }
  0x21   :  { %46 = vst [vmem:[#allocation5] sm:$0x3] %v44_v14 }
  0x22   :  { %111 = shalt.err (!%p108_p12)
}
  0x23   :  { %s112_s24 = scalar_lea.hbm %s165_s1, 32 }
  0x24   :  { %p113_p13 = scmp.ne.s32.totalorder %s165_s1, %s112_s24  ;;  %p116_p0 = scmp.lt.u32.totalorder %s112_s24, %s165_s1 }
  0x26   :  { %p118_p1 = pnand %p116_p0, %p113_p13 }
  0x28   :  { %121 = shalt.err (!%p118_p1)
}
  0x29   :  { %68 = dma.vmem_to_hbm [thread:$0]  %s66_s21, 32, %s165_s1, [#allocation4]  }
  0x2a   :  { %124 = dma.done.wait [#allocation4], 32  }
  0x2b   :  { %125 = vsyncadd [#allocation4], 4294967264 }
  0x2c   :  { %72 = vsyncpa [#allocation3], 1 }
  0x2d   :  { %73 = vsyncpa [#allocation4], 1 }

</bundles_post_ra>
